<compile_context>
chip_gen: v7x
topology: tpu7x:2x2x1
jax: 0.10.0
libtpu: 0.0.40
codegen_flags: <defaults>
</compile_context>

<pallas_src>
import functools
import math

import jax
import jax.numpy as jnp
from jax.experimental import pallas as pl
from jax.experimental.pallas import tpu as pltpu

LANE = 128          # lane-dense width used for every padded operand
N_WEIGHTS = 7       # ew1, ew2, ew3, w1_latent, w1_xyz, w2, w_heads


# ----------------------------- Fused model kernel ---------------------------

def fused_model_kernel(geom_ref, w_ref, b_ref, out_ref, *, B, N, S):
    f32, bf16 = jnp.float32, jnp.bfloat16
    BN = B * N
    R = B * S

    bias = b_ref[...]                                   # (8, 128) f32, one load

    def bvec(i):                                        # (1, 128) bias row
        return bias[i:i + 1, :]

    def w(i):                                           # (128, 128) bf16 weight slab
        return w_ref[i * LANE:(i + 1) * LANE, :]

    pts = geom_ref[0:BN, :].astype(bf16)                # (BN, 128), cols 3.. are zero
    xyz = geom_ref[BN:BN + R, :].astype(bf16)           # (R, 128),  cols 3.. are zero

    # ---- Encoder: per-point MLP on all B*N points (3 -> 64 -> 64 -> L, zero-padded) ----
    h = jnp.dot(pts, w(0), preferred_element_type=f32) + bvec(0)
    h = jnp.maximum(h, 0.0).astype(bf16)
    h = jnp.dot(h, w(1), preferred_element_type=f32) + bvec(1)
    h = jnp.maximum(h, 0.0).astype(bf16)
    h = jnp.dot(h, w(2), preferred_element_type=f32) + bvec(2)      # (BN, 128) f32

    # ---- Per-scene max-pool (single sublane reduce, no per-scene unroll) ----
    lat = jnp.max(h.reshape(B, N, LANE), axis=1)                    # (B, 128)

    # ---- Hoist latent through W1 BEFORE replication, then broadcast to R rows ----
    t0 = jnp.dot(lat.astype(bf16), w(3), preferred_element_type=f32)        # (B, 128)
    t0 = jnp.broadcast_to(t0[:, None, :], (B, S, LANE)).reshape(R, LANE)    # (R, 128)

    # ---- Decoder trunk: split-weight form of cat([latent, xyz], 1) @ W1 ----
    t = t0 + jnp.dot(xyz, w(4), preferred_element_type=f32) + bvec(3)
    t = jnp.maximum(t, 0.0).astype(bf16)
    t = jnp.maximum(jnp.dot(t, w(5), preferred_element_type=f32) + bvec(4), 0.0)

    # ---- Fused heads: one lane-dense (R, 128) matmul, tanh on the 2 SDF columns ----
    pre = jnp.dot(t.astype(bf16), w(6), preferred_element_type=f32) + bvec(5)
    col = jax.lax.broadcasted_iota(jnp.int32, pre.shape, 1)
    out_ref[...] = jnp.where(col < 2, jnp.tanh(pre), pre)           # unmasked 128-wide store


# ------------------------ Model forward (single launch) ---------------------

def model_forward(x1, xyz, w_blob, b_blob, *, num_samp_per_scene, nb_classes):
    B, N, _ = x1.shape
    S = num_samp_per_scene
    R = B * S
    BN = B * N
    assert xyz.shape == (R, 3)
    assert 2 + nb_classes <= LANE
    assert w_blob.shape == (N_WEIGHTS * LANE, LANE)
    assert b_blob.shape == (8, LANE)

    # Pack pts + xyz into ONE lane-dense geometry buffer: rows [0, BN) are points,
    # rows [BN, BN+R) are query coords; columns 3.. are zero (matching zero-padded
    # weight rows, so the math is unchanged).
    geom = jnp.zeros((BN + R, LANE), jnp.float32)
    geom = geom.at[:BN, :3].set(x1.reshape(BN, 3))
    geom = geom.at[BN:, :3].set(xyz)

    kernel = functools.partial(fused_model_kernel, B=B, N=N, S=S)

    # No grid: weights (~230 KB) + activations (~300 KB) are VMEM-resident in a single
    # invocation -- the model is latency-bound at this size.  See the scaling plan in the
    # header comment for how to tile R when it grows.
    out = pl.pallas_call(
        kernel,
        out_shape=jax.ShapeDtypeStruct((R, LANE), jnp.float32),
        in_specs=[pl.BlockSpec(memory_space=pltpu.MemorySpace.VMEM)] * 3,
        out_specs=pl.BlockSpec(memory_space=pltpu.MemorySpace.VMEM),
    )(geom, w_blob, b_blob)

    x_hand = out[:, 0:1]
    x_obj = out[:, 1:2]
    x_class = out[:, 2:2 + nb_classes]
    return x_hand, x_obj, x_class


# ----------------------------- Parameter init -------------------------------

def _dense_init(key, fan_in, fan_out):
    scale = 1.0 / math.sqrt(fan_in)
    w = jax.random.uniform(key, (fan_in, fan_out), jnp.float32, -scale, scale)
    b = jnp.zeros((1, fan_out), jnp.float32)
    return w, b


def _pad2d(a, rows, cols):
    return jnp.pad(a, ((0, rows - a.shape[0]), (0, cols - a.shape[1])))


def make_params(latent_dim, nb_classes, hidden_enc=64, hidden_dec=128):
    assert hidden_enc <= LANE and hidden_dec <= LANE and latent_dim <= LANE
    assert 2 + nb_classes <= LANE
    keys = jax.random.split(jax.random.PRNGKey(42), 8)

    # encoder: 3 -> hidden_enc -> hidden_enc -> latent
    ew1, eb1 = _dense_init(keys[0], 3, hidden_enc)
    ew2, eb2 = _dense_init(keys[1], hidden_enc, hidden_enc)
    ew3, eb3 = _dense_init(keys[2], hidden_enc, latent_dim)

    # decoder trunk: (latent+3) -> hidden_dec -> hidden_dec ; heads: hand(1), obj(1), class(C)
    din = latent_dim + 3
    dw1, db1 = _dense_init(keys[3], din, hidden_dec)
    dw2, db2 = _dense_init(keys[4], hidden_dec, hidden_dec)
    wh, bh = _dense_init(keys[5], hidden_dec, 1)
    wo, bo = _dense_init(keys[6], hidden_dec, 1)
    wc, bc = _dense_init(keys[7], hidden_dec, nb_classes)

    # Split W1 so cat([latent, xyz], 1) can be fused in-kernel; fuse + zero-pad the three
    # heads into one lane-dense 128-wide matmul ([hand | obj | class | pad]).
    w1_lat = dw1[:latent_dim, :]
    w1_xyz = dw1[latent_dim:, :]
    w_heads = jnp.concatenate([wh, wo, wc], axis=1)
    b_heads = jnp.concatenate([bh, bo, bc], axis=1)

    # One bf16 weight blob: each matrix zero-padded to (128, 128) and stacked on rows.
    mats = [ew1, ew2, ew3, w1_lat, w1_xyz, dw2, w_heads]
    w_blob = jnp.concatenate([_pad2d(m, LANE, LANE) for m in mats],
                             axis=0).astype(jnp.bfloat16)            # (7*128, 128)

    # One f32 bias blob: 6 bias rows zero-padded to 128 lanes, padded to 8 rows.
    biases = [eb1, eb2, eb3, db1, db2, b_heads]
    b_blob = jnp.concatenate([_pad2d(b, 1, LANE) for b in biases]
                             + [jnp.zeros((8 - len(biases), LANE), jnp.float32)],
                             axis=0)                                   # (8, 128)
    return w_blob, b_blob


# ---------------------------------- Main ------------------------------------

if __name__ == "__main__":
    B = 2                     # scenes
    N = 128                   # points per input cloud
    LATENT = 32               # encoder latent dim
    S = 8                     # num_samp_per_scene
    NB_CLASSES = 6

    key = jax.random.PRNGKey(0)
    k1, k2 = jax.random.split(key)
    x1 = jax.random.normal(k1, (B, N, 3), jnp.float32)                 # point clouds
    xyz = jax.random.uniform(k2, (B * S, 3), jnp.float32, -1.0, 1.0)   # query points

    w_blob, b_blob = make_params(LATENT, NB_CLASSES)

    fwd = jax.jit(functools.partial(
        model_forward, num_samp_per_scene=S, nb_classes=NB_CLASSES))
    x_hand, x_obj, x_class = fwd(x1, xyz, w_blob, b_blob)
    jax.block_until_ready((x_hand, x_obj, x_class))

    assert x_hand.shape == (B * S, 1)
    assert x_obj.shape == (B * S, 1)
    assert x_class.shape == (B * S, NB_CLASSES)
    print("KERNEL_OK")
</pallas_src>

<mosaic_0001>
module attributes {stable_mosaic.version = 11 : i64} {
  func.func @fused_model_kernel(%arg0: memref<272x128xf32, #tpu.memory_space<vmem>>, %arg1: memref<896x128xbf16, #tpu.memory_space<vmem>>, %arg2: memref<8x128xf32, #tpu.memory_space<vmem>>, %arg3: memref<16x128xf32, #tpu.memory_space<vmem>>) attributes {dimension_semantics = [], scalar_prefetch = 0 : i64, scratch_operands = 0 : i64, tpu.core_type = #tpu.core_type<tc>} {
    %c0 = arith.constant 0 : index
    %c0_0 = arith.constant 0 : index
    %0 = vector.load %arg2[%c0, %c0_0] : memref<8x128xf32, #tpu.memory_space<vmem>>, vector<8x128xf32>
    %c0_1 = arith.constant 0 : index
    %c0_2 = arith.constant 0 : index
    %1 = vector.load %arg0[%c0_1, %c0_2] : memref<272x128xf32, #tpu.memory_space<vmem>>, vector<256x128xf32>
    %2 = arith.truncf %1 : vector<256x128xf32> to vector<256x128xbf16>
    %c256 = arith.constant 256 : index
    %c0_3 = arith.constant 0 : index
    %3 = vector.load %arg0[%c256, %c0_3] : memref<272x128xf32, #tpu.memory_space<vmem>>, vector<16x128xf32>
    %4 = arith.truncf %3 : vector<16x128xf32> to vector<16x128xbf16>
    %c0_4 = arith.constant 0 : index
    %c0_5 = arith.constant 0 : index
    %5 = vector.load %arg1[%c0_4, %c0_5] : memref<896x128xbf16, #tpu.memory_space<vmem>>, vector<128x128xbf16>
    %cst = arith.constant dense<0.000000e+00> : vector<256x128xf32>
    %6 = tpu.matmul %2, %5, %cst {dimension_numbers = #tpu.dot_dimension_numbers<[1], [0], [0], [1], [0, 0, 1, 1], [], []>} : vector<256x128xbf16>, vector<128x128xbf16>, vector<256x128xf32> -> vector<256x128xf32>
    %7 = vector.extract_strided_slice %0 {offsets = [0, 0], sizes = [1, 128], strides = [1, 1]} : vector<8x128xf32> to vector<1x128xf32>
    %8 = vector.broadcast %7 : vector<1x128xf32> to vector<256x128xf32>
    %9 = arith.addf %6, %8 : vector<256x128xf32>
    %cst_6 = arith.constant 0.000000e+00 : f32
    %10 = vector.broadcast %cst_6 : f32 to vector<256x128xf32>
    %11 = arith.maximumf %9, %10 : vector<256x128xf32>
    %12 = arith.truncf %11 : vector<256x128xf32> to vector<256x128xbf16>
    %c128 = arith.constant 128 : index
    %c0_7 = arith.constant 0 : index
    %13 = vector.load %arg1[%c128, %c0_7] : memref<896x128xbf16, #tpu.memory_space<vmem>>, vector<128x128xbf16>
    %cst_8 = arith.constant dense<0.000000e+00> : vector<256x128xf32>
    %14 = tpu.matmul %12, %13, %cst_8 {dimension_numbers = #tpu.dot_dimension_numbers<[1], [0], [0], [1], [0, 0, 1, 1], [], []>} : vector<256x128xbf16>, vector<128x128xbf16>, vector<256x128xf32> -> vector<256x128xf32>
    %15 = vector.extract_strided_slice %0 {offsets = [1, 0], sizes = [1, 128], strides = [1, 1]} : vector<8x128xf32> to vector<1x128xf32>
    %16 = vector.broadcast %15 : vector<1x128xf32> to vector<256x128xf32>
    %17 = arith.addf %14, %16 : vector<256x128xf32>
    %cst_9 = arith.constant 0.000000e+00 : f32
    %18 = vector.broadcast %cst_9 : f32 to vector<256x128xf32>
    %19 = arith.maximumf %17, %18 : vector<256x128xf32>
    %20 = arith.truncf %19 : vector<256x128xf32> to vector<256x128xbf16>
    %c256_10 = arith.constant 256 : index
    %c0_11 = arith.constant 0 : index
    %21 = vector.load %arg1[%c256_10, %c0_11] : memref<896x128xbf16, #tpu.memory_space<vmem>>, vector<128x128xbf16>
    %cst_12 = arith.constant dense<0.000000e+00> : vector<256x128xf32>
    %22 = tpu.matmul %20, %21, %cst_12 {dimension_numbers = #tpu.dot_dimension_numbers<[1], [0], [0], [1], [0, 0, 1, 1], [], []>} : vector<256x128xbf16>, vector<128x128xbf16>, vector<256x128xf32> -> vector<256x128xf32>
    %23 = vector.extract_strided_slice %0 {offsets = [2, 0], sizes = [1, 128], strides = [1, 1]} : vector<8x128xf32> to vector<1x128xf32>
    %24 = vector.broadcast %23 : vector<1x128xf32> to vector<256x128xf32>
    %25 = arith.addf %22, %24 : vector<256x128xf32>
    %26 = vector.shape_cast %25 : vector<256x128xf32> to vector<2x128x128xf32>
    %cst_13 = arith.constant dense<0xFF800000> : vector<2x128xf32>
    %27 = vector.multi_reduction <maximumf>, %26, %cst_13 [1] : vector<2x128x128xf32> to vector<2x128xf32>
    %28 = arith.truncf %27 : vector<2x128xf32> to vector<2x128xbf16>
    %c384 = arith.constant 384 : index
    %c0_14 = arith.constant 0 : index
    %29 = vector.load %arg1[%c384, %c0_14] : memref<896x128xbf16, #tpu.memory_space<vmem>>, vector<128x128xbf16>
    %cst_15 = arith.constant dense<0.000000e+00> : vector<2x128xf32>
    %30 = tpu.matmul %28, %29, %cst_15 {dimension_numbers = #tpu.dot_dimension_numbers<[1], [0], [0], [1], [0, 0, 1, 1], [], []>} : vector<2x128xbf16>, vector<128x128xbf16>, vector<2x128xf32> -> vector<2x128xf32>
    %31 = vector.shape_cast %30 : vector<2x128xf32> to vector<2x1x128xf32>
    %32 = vector.shape_cast %31 : vector<2x1x128xf32> to vector<2x1x128xf32>
    %33 = vector.broadcast %32 : vector<2x1x128xf32> to vector<2x8x128xf32>
    %34 = vector.shape_cast %33 : vector<2x8x128xf32> to vector<16x128xf32>
    %c512 = arith.constant 512 : index
    %c0_16 = arith.constant 0 : index
    %35 = vector.load %arg1[%c512, %c0_16] : memref<896x128xbf16, #tpu.memory_space<vmem>>, vector<128x128xbf16>
    %cst_17 = arith.constant dense<0.000000e+00> : vector<16x128xf32>
    %36 = tpu.matmul %4, %35, %cst_17 {dimension_numbers = #tpu.dot_dimension_numbers<[1], [0], [0], [1], [0, 0, 1, 1], [], []>} : vector<16x128xbf16>, vector<128x128xbf16>, vector<16x128xf32> -> vector<16x128xf32>
    %37 = arith.addf %34, %36 : vector<16x128xf32>
    %38 = vector.extract_strided_slice %0 {offsets = [3, 0], sizes = [1, 128], strides = [1, 1]} : vector<8x128xf32> to vector<1x128xf32>
    %39 = vector.broadcast %38 : vector<1x128xf32> to vector<16x128xf32>
    %40 = arith.addf %37, %39 : vector<16x128xf32>
    %cst_18 = arith.constant 0.000000e+00 : f32
    %41 = vector.broadcast %cst_18 : f32 to vector<16x128xf32>
    %42 = arith.maximumf %40, %41 : vector<16x128xf32>
    %43 = arith.truncf %42 : vector<16x128xf32> to vector<16x128xbf16>
    %c640 = arith.constant 640 : index
    %c0_19 = arith.constant 0 : index
    %44 = vector.load %arg1[%c640, %c0_19] : memref<896x128xbf16, #tpu.memory_space<vmem>>, vector<128x128xbf16>
    %cst_20 = arith.constant dense<0.000000e+00> : vector<16x128xf32>
    %45 = tpu.matmul %43, %44, %cst_20 {dimension_numbers = #tpu.dot_dimension_numbers<[1], [0], [0], [1], [0, 0, 1, 1], [], []>} : vector<16x128xbf16>, vector<128x128xbf16>, vector<16x128xf32> -> vector<16x128xf32>
    %46 = vector.extract_strided_slice %0 {offsets = [4, 0], sizes = [1, 128], strides = [1, 1]} : vector<8x128xf32> to vector<1x128xf32>
    %47 = vector.broadcast %46 : vector<1x128xf32> to vector<16x128xf32>
    %48 = arith.addf %45, %47 : vector<16x128xf32>
    %cst_21 = arith.constant 0.000000e+00 : f32
    %49 = vector.broadcast %cst_21 : f32 to vector<16x128xf32>
    %50 = arith.maximumf %48, %49 : vector<16x128xf32>
    %51 = arith.truncf %50 : vector<16x128xf32> to vector<16x128xbf16>
    %c768 = arith.constant 768 : index
    %c0_22 = arith.constant 0 : index
    %52 = vector.load %arg1[%c768, %c0_22] : memref<896x128xbf16, #tpu.memory_space<vmem>>, vector<128x128xbf16>
    %cst_23 = arith.constant dense<0.000000e+00> : vector<16x128xf32>
    %53 = tpu.matmul %51, %52, %cst_23 {dimension_numbers = #tpu.dot_dimension_numbers<[1], [0], [0], [1], [0, 0, 1, 1], [], []>} : vector<16x128xbf16>, vector<128x128xbf16>, vector<16x128xf32> -> vector<16x128xf32>
    %54 = vector.extract_strided_slice %0 {offsets = [5, 0], sizes = [1, 128], strides = [1, 1]} : vector<8x128xf32> to vector<1x128xf32>
    %55 = vector.broadcast %54 : vector<1x128xf32> to vector<16x128xf32>
    %56 = arith.addf %53, %55 : vector<16x128xf32>
    %57 = tpu.iota {dimensions = array<i32: 1>} : vector<16x128xi32>
    %c2_i32 = arith.constant 2 : i32
    %58 = vector.broadcast %c2_i32 : i32 to vector<16x128xi32>
    %59 = arith.cmpi slt, %57, %58 : vector<16x128xi32>
    %60 = math.tanh %56 : vector<16x128xf32>
    %61 = arith.select %59, %60, %56 : vector<16x128xi1>, vector<16x128xf32>
    %c0_24 = arith.constant 0 : index
    %c0_25 = arith.constant 0 : index
    %62 = vector.load %arg3[%c0_24, %c0_25] : memref<16x128xf32, #tpu.memory_space<vmem>>, vector<16x128xf32>
    tpu.vector_store %arg3[%c0_24, %c0_25], %61 {strides = array<i32>} : memref<16x128xf32, #tpu.memory_space<vmem>>, vector<16x128xf32>,
    return
  }
}

</mosaic_0001>

<bundles_post_ra>
// kernel: model_forward.1
= control target key start
LH: loop header
LB: loop body
LE: loop exit
PB: predicated region body
PF: predicated region fallthrough
CT: control target
= control target key end

     0   :  { %vm1842_vm0 = vmmov 0   ;;  %vm914_vm1 = vcmask 1041409   ;;  %s2310_s1 = inlined_call_operand.vmem [shape: bf16[896,128], index: 1, kind: input, shape index: {}]   ;;  %s2311_s0 = inlined_call_operand.vmem [shape: f32[272,128], index: 0, kind: input, shape index: {}]   ;;  %s2312_s2 = inlined_call_operand.vmem [shape: f32[8,128], index: 2, kind: input, shape index: {}]   ;;  %s2313_s3 = inlined_call_operand.vmem [shape: f32[16,128], index: 3, kind: output, shape index: {}]  }
   0x1   :  { %v1780_v0 = vld [vmem:[%s2310_s1] sm:$0xff]   ;;  %v1781_v1 = vld [vmem:[%s2310_s1 + $0x8] sm:$0xff]   ;;  %v1782_v2 = vld [vmem:[%s2310_s1 + $0x10] sm:$0xff]  }
   0x2   :  { %1553 = vmatprep.subr.bf16.mxu0 %v1780_v0  ;;  %v1783_v3 = vld [vmem:[%s2310_s1 + $0x18] sm:$0xff]   ;;  %v16_v4 = vld [vmem:[%s2311_s0] sm:$0xff]  ;;  %v17_v5 = vld [vmem:[%s2311_s0 + $0x8] sm:$0xff] }
   0x3   :  { %1554 = vmatpush3.bf16.msra.mxu0 %v1780_v0  ;;  %v48_v6 = vpack.c.bf16 %v17_v5, %v16_v4  ;;  %v1784_v7 = vld [vmem:[%s2310_s1 + $0x20] sm:$0xff]   ;;  %v1785_v8 = vld [vmem:[%s2310_s1 + $0x28] sm:$0xff]   ;;  %v1786_v9 = vld [vmem:[%s2310_s1 + $0x30] sm:$0xff]  }
   0x4   :  { %1555 = vmatprep.subr.bf16.mxu0 %v1781_v1  ;;  %v1788_v10 = vld [vmem:[%s2310_s1 + $0x40] sm:$0xff]   ;;  %v1789_v11 = vld [vmem:[%s2310_s1 + $0x48] sm:$0xff]   ;;  %v1790_v12 = vld [vmem:[%s2310_s1 + $0x50] sm:$0xff]  }
   0x5   :  { %1569 = vmatprep.mubr.bf16.mxu0 %v48_v6  ;;  %1601 = vmatprep.subr.bf16.mxu1 %v1788_v10  ;;  %v1787_v13 = vld [vmem:[%s2310_s1 + $0x38] sm:$0xff]   ;;  %v18_v14 = vld [vmem:[%s2311_s0 + $0x10] sm:$0xff]  ;;  %v20_v17 = vld [vmem:[%s2311_s0 + $0x20] sm:$0xff] }
   0x6   :  { %1602 = vmatpush3.bf16.msra.mxu1 %v1788_v10  ;;  %v19_v15 = vld [vmem:[%s2311_s0 + $0x18] sm:$0xff]  ;;  %v21_v18 = vld [vmem:[%s2311_s0 + $0x28] sm:$0xff]  ;;  %v1792_v19 = vld [vmem:[%s2310_s1 + $0x60] sm:$0xff]  }
   0x7   :  { %1556 = vmatpush3.bf16.msra.mxu0 %v1781_v1  ;;  %1603 = vmatprep.subr.bf16.mxu1 %v1789_v11  ;;  %v1791_v16 = vld [vmem:[%s2310_s1 + $0x58] sm:$0xff]   ;;  %v49_v20 = vpack.c.bf16 %v19_v15, %v18_v14  ;;  %v50_v21 = vpack.c.bf16 %v21_v18, %v20_v17  ;;  %v22_v22 = vld [vmem:[%s2311_s0 + $0x30] sm:$0xff]  ;;  %v1793_v24 = vld [vmem:[%s2310_s1 + $0x68] sm:$0xff]  }
   0x8   :  { %1557 = vmatprep.subr.bf16.mxu0 %v1782_v2  ;;  %v23_v23 = vld [vmem:[%s2311_s0 + $0x38] sm:$0xff]  ;;  %v24_v25 = vld [vmem:[%s2311_s0 + $0x40] sm:$0xff]  ;;  %v25_v26 = vld [vmem:[%s2311_s0 + $0x48] sm:$0xff] }
   0x9   :  { %v51_v27 = vpack.c.bf16 %v23_v23, %v22_v22  ;;  %v52_v28 = vpack.c.bf16 %v25_v26, %v24_v25  ;;  %v26_v29 = vld [vmem:[%s2311_s0 + $0x50] sm:$0xff]  ;;  %v27_v30 = vld [vmem:[%s2311_s0 + $0x58] sm:$0xff]  ;;  %v28_v31 = vld [vmem:[%s2311_s0 + $0x60] sm:$0xff] }
   0xa   :  { %1604 = vmatpush3.bf16.msra.mxu1 %v1789_v11  ;;  %v29_v32 = vld [vmem:[%s2311_s0 + $0x68] sm:$0xff]  ;;  %v53_v33 = vpack.c.bf16 %v27_v30, %v26_v29  ;;  %v30_v35 = vld [vmem:[%s2311_s0 + $0x70] sm:$0xff]  ;;  %v31_v36 = vld [vmem:[%s2311_s0 + $0x78] sm:$0xff] }
   0xb   :  { %1558 = vmatpush3.bf16.msra.mxu0 %v1782_v2  ;;  %1605 = vmatprep.subr.bf16.mxu1 %v1790_v12  ;;  %v54_v34 = vpack.c.bf16 %v29_v32, %v28_v31  ;;  %v32_v37 = vld [vmem:[%s2311_s0 + $0x80] sm:$0xff]  ;;  %v33_v38 = vld [vmem:[%s2311_s0 + $0x88] sm:$0xff]  ;;  %v55_v39 = vpack.c.bf16 %v31_v36, %v30_v35  ;;  %v34_v41 = vld [vmem:[%s2311_s0 + $0x90] sm:$0xff] }
   0xc   :  { %1559 = vmatprep.subr.bf16.mxu0 %v1783_v3  ;;  %v56_v40 = vpack.c.bf16 %v33_v38, %v32_v37  ;;  %v35_v42 = vld [vmem:[%s2311_s0 + $0x98] sm:$0xff]  ;;  %v36_v43 = vld [vmem:[%s2311_s0 + $0xa0] sm:$0xff]  ;;  %v37_v44 = vld [vmem:[%s2311_s0 + $0xa8] sm:$0xff] }
   0xd   :  { %v57_v45 = vpack.c.bf16 %v35_v42, %v34_v41  ;;  %v58_v46 = vpack.c.bf16 %v37_v44, %v36_v43  ;;  %v38_v47 = vld [vmem:[%s2311_s0 + $0xb0] sm:$0xff]  ;;  %v39_v48 = vld [vmem:[%s2311_s0 + $0xb8] sm:$0xff]  ;;  %v40_v49 = vld [vmem:[%s2311_s0 + $0xc0] sm:$0xff] }
   0xe   :  { %1606 = vmatpush3.bf16.msra.mxu1 %v1790_v12  ;;  %v41_v50 = vld [vmem:[%s2311_s0 + $0xc8] sm:$0xff]  ;;  %v59_v51 = vpack.c.bf16 %v39_v48, %v38_v47  ;;  %v42_v53 = vld [vmem:[%s2311_s0 + $0xd0] sm:$0xff]  ;;  %v43_v54 = vld [vmem:[%s2311_s0 + $0xd8] sm:$0xff] }
   0xf   :  { %1560 = vmatpush3.bf16.msra.mxu0 %v1783_v3  ;;  %1607 = vmatprep.subr.bf16.mxu1 %v1791_v16  ;;  %v60_v52 = vpack.c.bf16 %v41_v50, %v40_v49  ;;  %v44_v55 = vld [vmem:[%s2311_s0 + $0xe0] sm:$0xff]  ;;  %v45_v56 = vld [vmem:[%s2311_s0 + $0xe8] sm:$0xff]  ;;  %v61_v57 = vpack.c.bf16 %v43_v54, %v42_v53  ;;  %v46_v59 = vld [vmem:[%s2311_s0 + $0xf0] sm:$0xff] }
  0x10   :  { %1561 = vmatprep.subr.bf16.mxu0 %v1784_v7  ;;  %v62_v58 = vpack.c.bf16 %v45_v56, %v44_v55  ;;  %v47_v60 = vld [vmem:[%s2311_s0 + $0xf8] sm:$0xff]  ;;  %v1794_v62 = vld [vmem:[%s2310_s1 + $0x70] sm:$0xff]   ;;  %v1796_v0 = vld [vmem:[%s2310_s1 + $0x80] sm:$0xff]  }
  0x11   :  { %v63_v61 = vpack.c.bf16 %v47_v60, %v46_v59  ;;  %v1795_v63 = vld [vmem:[%s2310_s1 + $0x78] sm:$0xff]   ;;  %v1797_v1 = vld [vmem:[%s2310_s1 + $0x88] sm:$0xff]   ;;  %v1798_v2 = vld [vmem:[%s2310_s1 + $0x90] sm:$0xff]  }
  0x12   :  { %1608 = vmatpush3.bf16.msra.mxu1 %v1791_v16  ;;  %v1799_v3 = vld [vmem:[%s2310_s1 + $0x98] sm:$0xff]   ;;  %v1800_v4 = vld [vmem:[%s2310_s1 + $0xa0] sm:$0xff]   ;;  %v1801_v5 = vld [vmem:[%s2310_s1 + $0xa8] sm:$0xff]  }
  0x13   :  { %1562 = vmatpush3.bf16.msra.mxu0 %v1784_v7  ;;  %1609 = vmatprep.subr.bf16.mxu1 %v1792_v19  ;;  %v1802_v6 = vld [vmem:[%s2310_s1 + $0xb0] sm:$0xff]   ;;  %v83_v7 = vlaneseq  ;;  %v2038_v10 = vld [vmem:[%s2312_s2] sm:$0xff] }
  0x14   :  { %1563 = vmatprep.subr.bf16.mxu0 %v1785_v8 }
  0x16   :  { %1610 = vmatpush3.bf16.msra.mxu1 %v1792_v19 }
  0x17   :  { %1564 = vmatpush3.bf16.msra.mxu0 %v1785_v8  ;;  %1611 = vmatprep.subr.bf16.mxu1 %v1793_v24  ;;  %v2030_v8 = vshrl.u32 %v83_v7, 7 }
  0x18   :  { %1565 = vmatprep.subr.bf16.mxu0 %v1786_v9 }
  0x1a   :  { %1612 = vmatpush3.bf16.msra.mxu1 %v1793_v24 }
  0x1b   :  { %1566 = vmatpush3.bf16.msra.mxu0 %v1786_v9  ;;  %1613 = vmatprep.subr.bf16.mxu1 %v1794_v62  ;;  %v2033_v9 = vsub.s32 0, %v2030_v8 }
  0x1c   :  { %1567 = vmatprep.subr.bf16.mxu0 %v1787_v13 }
  0x1d   :  { %v2042_v11 = vrot.slane %v2038_v10, %v2033_v9 }
  0x1e   :  { %1614 = vmatpush3.bf16.msra.mxu1 %v1794_v62 }
  0x1f   :  { %1568 = vmatpush3.bf16.msra.mxu0 %v1787_v13  ;;  %1615 = vmatprep.subr.bf16.mxu1 %v1795_v63 }
  0x20   :  { %1649 = vmatprep.subr.bf16.mxu0 %v1796_v0 }
  0x22   :  { %1570 = vmatmul.mubr.bf16.vlgmr.msra.gmra.mrb[0].mxu0 %v49_v20  ;;  %1616 = vmatpush3.bf16.msra.mxu1 %v1795_v63 }
  0x23   :  { %1573 = vmatprep.mubr.bf16.mxu0 %v50_v21  ;;  %1650 = vmatpush3.bf16.msra.mxu0 %v1796_v0 }
  0x24   :  { %1651 = vmatprep.subr.bf16.mxu0 %v1797_v1 }
  0x27   :  { %1652 = vmatpush3.bf16.msra.mxu0 %v1797_v1 }
  0x28   :  { %1653 = vmatprep.subr.bf16.mxu0 %v1798_v2 }
  0x2a   :  { %1574 = vmatmul.mubr.bf16.gmra.mrb[4].mxu0 %v51_v27 }
  0x2b   :  { %1577 = vmatprep.mubr.bf16.mxu0 %v52_v28  ;;  %1654 = vmatpush3.bf16.msra.mxu0 %v1798_v2 }
  0x2c   :  { %1655 = vmatprep.subr.bf16.mxu0 %v1799_v3 }
  0x2f   :  { %1656 = vmatpush3.bf16.msra.mxu0 %v1799_v3 }
  0x30   :  { %1657 = vmatprep.subr.bf16.mxu0 %v1800_v4 }
  0x32   :  { %1578 = vmatmul.mubr.bf16.gmra.mrb[8].mxu0 %v53_v33 }
  0x33   :  { %1581 = vmatprep.mubr.bf16.mxu0 %v54_v34  ;;  %1658 = vmatpush3.bf16.msra.mxu0 %v1800_v4 }
  0x34   :  { %1659 = vmatprep.subr.bf16.mxu0 %v1801_v5 }
  0x37   :  { %1660 = vmatpush3.bf16.msra.mxu0 %v1801_v5 }
  0x38   :  { %1661 = vmatprep.subr.bf16.mxu0 %v1802_v6 }
  0x3a   :  { %1582 = vmatmul.mubr.bf16.gmra.mrb[12].mxu0 %v55_v39 }
  0x3b   :  { %1585 = vmatprep.mubr.bf16.mxu0 %v56_v40  ;;  %1662 = vmatpush3.bf16.msra.mxu0 %v1802_v6 }
  0x42   :  { %1586 = vmatmul.mubr.bf16.gmra.mrb[16].mxu0 %v57_v45 }
  0x43   :  { %1589 = vmatprep.mubr.bf16.mxu0 %v58_v46 }
  0x4a   :  { %1590 = vmatmul.mubr.bf16.gmra.mrb[20].mxu0 %v59_v51 }
  0x4b   :  { %1593 = vmatprep.mubr.bf16.mxu0 %v60_v52 }
  0x52   :  { %1594 = vmatmul.mubr.bf16.gmra.mrb[24].mxu0 %v61_v57 }
  0x53   :  { %1597 = vmatprep.mubr.bf16.mxu0 %v62_v58 }
  0x5a   :  { %1598 = vmatmul.mubr.bf16.gmra.mrb[28].mxu0 %v63_v61 }
  0xf5   :  { %v1571_v12 = vpop.f32.mrb[0].mxu0 }
  0xf6   :  { %v178_v13 = vadd.f32 %v1571_v12, %v2042_v11  ;;  %v169_v14 = vpop.f32.mrb[1].mxu0 }
  0xf7   :  { %v170_v15 = vadd.f32 %v169_v14, %v2042_v11  ;;  %v1572_v16 = vpop.f32.mrb[2].mxu0 }
  0xf8   :  { %v181_v17 = vadd.f32 %v1572_v16, %v2042_v11  ;;  %v172_v18 = vpop.f32.mrb[3].mxu0  ;;  %v298_v20 = vmax.f32 %v178_v13, 0.0 }
  0xf9   :  { %v173_v19 = vadd.f32 %v172_v18, %v2042_v11  ;;  %v296_v22 = vmax.f32 %v170_v15, 0.0 }
  0xfa   :  { %v299_v21 = vmax.f32 %v181_v17, 0.0 }
  0xfb   :  { %v297_v23 = vmax.f32 %v173_v19, 0.0 }
  0xfc   :  { %v329_v24 = vpack.c.bf16 %v299_v21, %v298_v20 }
  0xfd   :  { %v1575_v25 = vpop.f32.mrb[4].mxu0  ;;  %v328_v26 = vpack.c.bf16 %v297_v23, %v296_v22 }
  0xfe   :  { %v194_v27 = vadd.f32 %v1575_v25, %v2042_v11  ;;  %v185_v28 = vpop.f32.mrb[5].mxu0 }
  0xff   :  { %v186_v29 = vadd.f32 %v185_v28, %v2042_v11  ;;  %v1576_v30 = vpop.f32.mrb[6].mxu0  ;;  %1617 = vmatprep.mubr.bf16.mxu1 %v328_v26 }
 0x100   :  { %v197_v31 = vadd.f32 %v1576_v30, %v2042_v11  ;;  %v188_v32 = vpop.f32.mrb[7].mxu0  ;;  %1618 = vmatmul.mubr.bf16.vlgmr.msra.gmra.mrb[0].mxu1 %v329_v24  ;;  %v302_v34 = vmax.f32 %v194_v27, 0.0 }
 0x101   :  { %v189_v33 = vadd.f32 %v188_v32, %v2042_v11  ;;  %v300_v36 = vmax.f32 %v186_v29, 0.0 }
 0x102   :  { %v303_v35 = vmax.f32 %v197_v31, 0.0 }
 0x103   :  { %v301_v37 = vmax.f32 %v189_v33, 0.0 }
 0x104   :  { %v331_v38 = vpack.c.bf16 %v303_v35, %v302_v34 }
 0x105   :  { %v330_v39 = vpack.c.bf16 %v301_v37, %v300_v36  ;;  %v1579_v40 = vpop.f32.mrb[8].mxu0 }
 0x106   :  { %v210_v41 = vadd.f32 %v1579_v40, %v2042_v11  ;;  %v201_v42 = vpop.f32.mrb[9].mxu0 }
 0x107   :  { %v202_v43 = vadd.f32 %v201_v42, %v2042_v11  ;;  %v1580_v44 = vpop.f32.mrb[10].mxu0  ;;  %1621 = vmatprep.mubr.bf16.mxu1 %v330_v39 }
 0x108   :  { %v213_v45 = vadd.f32 %v1580_v44, %v2042_v11  ;;  %v204_v46 = vpop.f32.mrb[11].mxu0  ;;  %1622 = vmatmul.mubr.bf16.gmra.mrb[4].mxu1 %v331_v38  ;;  %v306_v48 = vmax.f32 %v210_v41, 0.0 }
 0x109   :  { %v205_v47 = vadd.f32 %v204_v46, %v2042_v11  ;;  %v304_v50 = vmax.f32 %v202_v43, 0.0 }
 0x10a   :  { %v307_v49 = vmax.f32 %v213_v45, 0.0 }
 0x10b   :  { %v305_v51 = vmax.f32 %v205_v47, 0.0 }
 0x10c   :  { %v333_v52 = vpack.c.bf16 %v307_v49, %v306_v48 }
 0x10d   :  { %v332_v53 = vpack.c.bf16 %v305_v51, %v304_v50  ;;  %v1583_v54 = vpop.f32.mrb[12].mxu0 }
 0x10e   :  { %v226_v55 = vadd.f32 %v1583_v54, %v2042_v11  ;;  %v217_v56 = vpop.f32.mrb[13].mxu0 }
 0x10f   :  { %v218_v57 = vadd.f32 %v217_v56, %v2042_v11  ;;  %v1584_v58 = vpop.f32.mrb[14].mxu0  ;;  %1625 = vmatprep.mubr.bf16.mxu1 %v332_v53 }
 0x110   :  { %v229_v59 = vadd.f32 %v1584_v58, %v2042_v11  ;;  %v220_v60 = vpop.f32.mrb[15].mxu0  ;;  %1626 = vmatmul.mubr.bf16.gmra.mrb[8].mxu1 %v333_v52  ;;  %v310_v62 = vmax.f32 %v226_v55, 0.0 }
 0x111   :  { %v221_v61 = vadd.f32 %v220_v60, %v2042_v11  ;;  %v308_v0 = vmax.f32 %v218_v57, 0.0 }
 0x112   :  { %v311_v63 = vmax.f32 %v229_v59, 0.0 }
 0x113   :  { %v309_v1 = vmax.f32 %v221_v61, 0.0 }
 0x114   :  { %v335_v2 = vpack.c.bf16 %v311_v63, %v310_v62 }
 0x115   :  { %v334_v3 = vpack.c.bf16 %v309_v1, %v308_v0  ;;  %v1587_v4 = vpop.f32.mrb[16].mxu0  ;;  %v1803_v1 = vld [vmem:[%s2310_s1 + $0xb8] sm:$0xff]  }
 0x116   :  { %v242_v5 = vadd.f32 %v1587_v4, %v2042_v11  ;;  %v233_v6 = vpop.f32.mrb[17].mxu0  ;;  %1663 = vmatprep.subr.bf16.mxu0 %v1803_v1 }
 0x117   :  { %v234_v12 = vadd.f32 %v233_v6, %v2042_v11  ;;  %v1588_v13 = vpop.f32.mrb[18].mxu0  ;;  %1629 = vmatprep.mubr.bf16.mxu1 %v334_v3  ;;  %1664 = vmatpush3.bf16.msra.mxu0 %v1803_v1 }
 0x118   :  { %v245_v14 = vadd.f32 %v1588_v13, %v2042_v11  ;;  %v236_v15 = vpop.f32.mrb[19].mxu0  ;;  %1630 = vmatmul.mubr.bf16.gmra.mrb[12].mxu1 %v335_v2  ;;  %v314_v17 = vmax.f32 %v242_v5, 0.0  ;;  %v362_v2 = vsub.s32 1, %v2030_v8 }
 0x119   :  { %v237_v16 = vadd.f32 %v236_v15, %v2042_v11  ;;  %v312_v19 = vmax.f32 %v234_v12, 0.0 }
 0x11a   :  { %v315_v18 = vmax.f32 %v245_v14, 0.0  ;;  %v2081_v3 = vrot.slane %v2038_v10, %v362_v2 }
 0x11b   :  { %v313_v20 = vmax.f32 %v237_v16, 0.0 }
 0x11c   :  { %v337_v21 = vpack.c.bf16 %v315_v18, %v314_v17 }
 0x11d   :  { %v336_v22 = vpack.c.bf16 %v313_v20, %v312_v19  ;;  %v1591_v23 = vpop.f32.mrb[20].mxu0 }
 0x11e   :  { %v258_v24 = vadd.f32 %v1591_v23, %v2042_v11  ;;  %v249_v25 = vpop.f32.mrb[21].mxu0 }
 0x11f   :  { %v250_v26 = vadd.f32 %v249_v25, %v2042_v11  ;;  %v1592_v27 = vpop.f32.mrb[22].mxu0  ;;  %1633 = vmatprep.mubr.bf16.mxu1 %v336_v22 }
 0x120   :  { %v261_v28 = vadd.f32 %v1592_v27, %v2042_v11  ;;  %v252_v29 = vpop.f32.mrb[23].mxu0  ;;  %1634 = vmatmul.mubr.bf16.gmra.mrb[16].mxu1 %v337_v21  ;;  %v318_v31 = vmax.f32 %v258_v24, 0.0 }
 0x121   :  { %v253_v30 = vadd.f32 %v252_v29, %v2042_v11  ;;  %v316_v33 = vmax.f32 %v250_v26, 0.0 }
 0x122   :  { %v319_v32 = vmax.f32 %v261_v28, 0.0 }
 0x123   :  { %v317_v34 = vmax.f32 %v253_v30, 0.0 }
 0x124   :  { %v339_v35 = vpack.c.bf16 %v319_v32, %v318_v31 }
 0x125   :  { %v338_v36 = vpack.c.bf16 %v317_v34, %v316_v33  ;;  %v1595_v37 = vpop.f32.mrb[24].mxu0 }
 0x126   :  { %v274_v38 = vadd.f32 %v1595_v37, %v2042_v11  ;;  %v265_v39 = vpop.f32.mrb[25].mxu0 }
 0x127   :  { %v266_v40 = vadd.f32 %v265_v39, %v2042_v11  ;;  %v1596_v41 = vpop.f32.mrb[26].mxu0  ;;  %1637 = vmatprep.mubr.bf16.mxu1 %v338_v36 }
 0x128   :  { %v277_v42 = vadd.f32 %v1596_v41, %v2042_v11  ;;  %v268_v43 = vpop.f32.mrb[27].mxu0  ;;  %1638 = vmatmul.mubr.bf16.gmra.mrb[20].mxu1 %v339_v35  ;;  %v322_v45 = vmax.f32 %v274_v38, 0.0 }
 0x129   :  { %v269_v44 = vadd.f32 %v268_v43, %v2042_v11  ;;  %v320_v47 = vmax.f32 %v266_v40, 0.0 }
 0x12a   :  { %v323_v46 = vmax.f32 %v277_v42, 0.0 }
 0x12b   :  { %v321_v48 = vmax.f32 %v269_v44, 0.0 }
 0x12c   :  { %v341_v49 = vpack.c.bf16 %v323_v46, %v322_v45 }
 0x12d   :  { %v340_v50 = vpack.c.bf16 %v321_v48, %v320_v47  ;;  %v1599_v51 = vpop.f32.mrb[28].mxu0 }
 0x12e   :  { %v290_v52 = vadd.f32 %v1599_v51, %v2042_v11  ;;  %v281_v53 = vpop.f32.mrb[29].mxu0 }
 0x12f   :  { %v282_v54 = vadd.f32 %v281_v53, %v2042_v11  ;;  %v1600_v55 = vpop.f32.mrb[30].mxu0  ;;  %1641 = vmatprep.mubr.bf16.mxu1 %v340_v50 }
 0x130   :  { %v293_v56 = vadd.f32 %v1600_v55, %v2042_v11  ;;  %v284_v57 = vpop.f32.mrb[31].mxu0  ;;  %1642 = vmatmul.mubr.bf16.gmra.mrb[24].mxu1 %v341_v49  ;;  %v326_v59 = vmax.f32 %v290_v52, 0.0 }
 0x131   :  { %v285_v58 = vadd.f32 %v284_v57, %v2042_v11  ;;  %v324_v61 = vmax.f32 %v282_v54, 0.0 }
 0x132   :  { %v327_v60 = vmax.f32 %v293_v56, 0.0 }
 0x133   :  { %v325_v62 = vmax.f32 %v285_v58, 0.0 }
 0x134   :  { %v343_v63 = vpack.c.bf16 %v327_v60, %v326_v59 }
 0x135   :  { %v342_v0 = vpack.c.bf16 %v325_v62, %v324_v61 }
 0x137   :  { %1645 = vmatprep.mubr.bf16.mxu1 %v342_v0 }
 0x138   :  { %1646 = vmatmul.mubr.bf16.gmra.mrb[28].mxu1 %v343_v63 }
 0x1d3   :  { %v1619_v11 = vpop.f32.mrb[0].mxu1 }
 0x1d4   :  { %v455_v4 = vadd.f32 %v1619_v11, %v2081_v3  ;;  %v446_v5 = vpop.f32.mrb[1].mxu1 }
 0x1d5   :  { %v447_v6 = vadd.f32 %v446_v5, %v2081_v3  ;;  %v1620_v12 = vpop.f32.mrb[2].mxu1 }
 0x1d6   :  { %v458_v13 = vadd.f32 %v1620_v12, %v2081_v3  ;;  %v449_v14 = vpop.f32.mrb[3].mxu1  ;;  %v575_v16 = vmax.f32 %v455_v4, 0.0 }
 0x1d7   :  { %v450_v15 = vadd.f32 %v449_v14, %v2081_v3  ;;  %v573_v18 = vmax.f32 %v447_v6, 0.0 }
 0x1d8   :  { %v576_v17 = vmax.f32 %v458_v13, 0.0 }
 0x1d9   :  { %v574_v19 = vmax.f32 %v450_v15, 0.0 }
 0x1da   :  { %v606_v20 = vpack.c.bf16 %v576_v17, %v575_v16 }
 0x1db   :  { %v605_v21 = vpack.c.bf16 %v574_v19, %v573_v18  ;;  %v1623_v22 = vpop.f32.mrb[4].mxu1 }
 0x1dc   :  { %v471_v23 = vadd.f32 %v1623_v22, %v2081_v3  ;;  %v462_v24 = vpop.f32.mrb[5].mxu1 }
 0x1dd   :  { %v463_v25 = vadd.f32 %v462_v24, %v2081_v3  ;;  %v1624_v26 = vpop.f32.mrb[6].mxu1  ;;  %1665 = vmatprep.mubr.bf16.mxu0 %v605_v21 }
 0x1de   :  { %v474_v27 = vadd.f32 %v1624_v26, %v2081_v3  ;;  %v465_v28 = vpop.f32.mrb[7].mxu1  ;;  %1666 = vmatmul.mubr.bf16.vlgmr.msra.gmra.mrb[32].mxu0 %v606_v20  ;;  %v579_v30 = vmax.f32 %v471_v23, 0.0 }
 0x1df   :  { %v466_v29 = vadd.f32 %v465_v28, %v2081_v3  ;;  %v577_v32 = vmax.f32 %v463_v25, 0.0 }
 0x1e0   :  { %v580_v31 = vmax.f32 %v474_v27, 0.0 }
 0x1e1   :  { %v578_v33 = vmax.f32 %v466_v29, 0.0 }
 0x1e2   :  { %v608_v34 = vpack.c.bf16 %v580_v31, %v579_v30 }
 0x1e3   :  { %v607_v35 = vpack.c.bf16 %v578_v33, %v577_v32  ;;  %v1627_v36 = vpop.f32.mrb[8].mxu1 }
 0x1e4   :  { %v487_v37 = vadd.f32 %v1627_v36, %v2081_v3  ;;  %v478_v38 = vpop.f32.mrb[9].mxu1 }
 0x1e5   :  { %v479_v39 = vadd.f32 %v478_v38, %v2081_v3  ;;  %v1628_v40 = vpop.f32.mrb[10].mxu1  ;;  %1669 = vmatprep.mubr.bf16.mxu0 %v607_v35 }
 0x1e6   :  { %v490_v41 = vadd.f32 %v1628_v40, %v2081_v3  ;;  %v481_v42 = vpop.f32.mrb[11].mxu1  ;;  %1670 = vmatmul.mubr.bf16.gmra.mrb[36].mxu0 %v608_v34  ;;  %v583_v44 = vmax.f32 %v487_v37, 0.0 }
 0x1e7   :  { %v482_v43 = vadd.f32 %v481_v42, %v2081_v3  ;;  %v581_v46 = vmax.f32 %v479_v39, 0.0 }
 0x1e8   :  { %v584_v45 = vmax.f32 %v490_v41, 0.0 }
 0x1e9   :  { %v582_v47 = vmax.f32 %v482_v43, 0.0 }
 0x1ea   :  { %v610_v48 = vpack.c.bf16 %v584_v45, %v583_v44 }
 0x1eb   :  { %v609_v49 = vpack.c.bf16 %v582_v47, %v581_v46  ;;  %v1631_v50 = vpop.f32.mrb[12].mxu1 }
 0x1ec   :  { %v503_v51 = vadd.f32 %v1631_v50, %v2081_v3  ;;  %v494_v52 = vpop.f32.mrb[13].mxu1 }
 0x1ed   :  { %v495_v53 = vadd.f32 %v494_v52, %v2081_v3  ;;  %v1632_v54 = vpop.f32.mrb[14].mxu1  ;;  %1673 = vmatprep.mubr.bf16.mxu0 %v609_v49 }
 0x1ee   :  { %v506_v55 = vadd.f32 %v1632_v54, %v2081_v3  ;;  %v497_v56 = vpop.f32.mrb[15].mxu1  ;;  %1674 = vmatmul.mubr.bf16.gmra.mrb[40].mxu0 %v610_v48  ;;  %v587_v58 = vmax.f32 %v503_v51, 0.0 }
 0x1ef   :  { %v498_v57 = vadd.f32 %v497_v56, %v2081_v3  ;;  %v585_v60 = vmax.f32 %v495_v53, 0.0 }
 0x1f0   :  { %v588_v59 = vmax.f32 %v506_v55, 0.0 }
 0x1f1   :  { %v586_v61 = vmax.f32 %v498_v57, 0.0 }
 0x1f2   :  { %v612_v62 = vpack.c.bf16 %v588_v59, %v587_v58 }
 0x1f3   :  { %v611_v63 = vpack.c.bf16 %v586_v61, %v585_v60  ;;  %v1635_v0 = vpop.f32.mrb[16].mxu1  ;;  %v1804_v61 = vld [vmem:[%s2310_s1 + $0xc0] sm:$0xff]  }
 0x1f4   :  { %v519_v1 = vadd.f32 %v1635_v0, %v2081_v3  ;;  %v510_v2 = vpop.f32.mrb[17].mxu1  ;;  %v1807_v0 = vld [vmem:[%s2310_s1 + $0xd8] sm:$0xff]  }
 0x1f5   :  { %v511_v11 = vadd.f32 %v510_v2, %v2081_v3  ;;  %v1636_v4 = vpop.f32.mrb[18].mxu1  ;;  %1677 = vmatprep.mubr.bf16.mxu0 %v611_v63  ;;  %v1806_v63 = vld [vmem:[%s2310_s1 + $0xd0] sm:$0xff]   ;;  %v1809_v2 = vld [vmem:[%s2310_s1 + $0xe8] sm:$0xff]  }
 0x1f6   :  { %v522_v5 = vadd.f32 %v1636_v4, %v2081_v3  ;;  %v513_v6 = vpop.f32.mrb[19].mxu1  ;;  %1678 = vmatmul.mubr.bf16.gmra.mrb[44].mxu0 %v612_v62  ;;  %v591_v13 = vmax.f32 %v519_v1, 0.0  ;;  %v1841_v62 = vmov 0.0   ;;  %v1808_v1 = vld [vmem:[%s2310_s1 + $0xe0] sm:$0xff]   ;;  %v1811_v4 = vld [vmem:[%s2310_s1 + $0xf8] sm:$0xff]  }
 0x1f7   :  { %v514_v12 = vadd.f32 %v513_v6, %v2081_v3  ;;  %v589_v15 = vmax.f32 %v511_v11, 0.0  ;;  %1697 = vmatprep.subr.bf16.mxu1 %v1841_v62  ;;  %1737 = vmatprep.subr.bf16.mxu0 %v1841_v62  ;;  %v1810_v11 = vld [vmem:[%s2310_s1 + $0xf0] sm:$0xff]   ;;  %v639_v6 = vsub.s32 2, %v2030_v8 }
 0x1f8   :  { %v592_v14 = vmax.f32 %v522_v5, 0.0  ;;  %1698 = vmatpush3.bf16.msra.mxu1 %v1804_v61  ;;  %1713 = vmatprep.mubr.msk.bf16.mxu1 %vm1842_vm0, %v1841_v62  ;;  %v1820_v5 = vld [vmem:[%s2310_s1 + $0x140] sm:$0xff]  }
 0x1f9   :  { %v590_v16 = vmax.f32 %v514_v12, 0.0  ;;  %1699 = vmatprep.subr.bf16.mxu1 %v1841_v62  ;;  %1738 = vmatpush3.bf16.msra.mxu0 %v1820_v5  ;;  %v1821_v12 = vld [vmem:[%s2310_s1 + $0x148] sm:$0xff]  }
 0x1fa   :  { %v614_v17 = vpack.c.bf16 %v592_v14, %v591_v13  ;;  %1739 = vmatprep.subr.bf16.mxu0 %v1841_v62  ;;  %v2162_v13 = vrot.slane %v2038_v10, %v639_v6  ;;  %v1822_v14 = vld [vmem:[%s2310_s1 + $0x150] sm:$0xff]  }
 0x1fb   :  { %v613_v18 = vpack.c.bf16 %v590_v16, %v589_v15  ;;  %v1639_v19 = vpop.f32.mrb[20].mxu1 }
 0x1fc   :  { %v535_v20 = vadd.f32 %v1639_v19, %v2081_v3  ;;  %v526_v21 = vpop.f32.mrb[21].mxu1 }
 0x1fd   :  { %v527_v22 = vadd.f32 %v526_v21, %v2081_v3  ;;  %v1640_v23 = vpop.f32.mrb[22].mxu1  ;;  %1681 = vmatprep.mubr.bf16.mxu0 %v613_v18  ;;  %1740 = vmatpush3.bf16.msra.mxu0 %v1821_v12 }
 0x1fe   :  { %v538_v24 = vadd.f32 %v1640_v23, %v2081_v3  ;;  %v529_v25 = vpop.f32.mrb[23].mxu1  ;;  %1682 = vmatmul.mubr.bf16.gmra.mrb[48].mxu0 %v614_v17  ;;  %v595_v27 = vmax.f32 %v535_v20, 0.0  ;;  %1741 = vmatprep.subr.bf16.mxu0 %v1841_v62 }
 0x1ff   :  { %v530_v26 = vadd.f32 %v529_v25, %v2081_v3  ;;  %v593_v29 = vmax.f32 %v527_v22, 0.0 }
 0x200   :  { %v596_v28 = vmax.f32 %v538_v24, 0.0 }
 0x201   :  { %v594_v30 = vmax.f32 %v530_v26, 0.0  ;;  %1742 = vmatpush3.bf16.msra.mxu0 %v1822_v14 }
 0x202   :  { %v616_v31 = vpack.c.bf16 %v596_v28, %v595_v27  ;;  %1743 = vmatprep.subr.bf16.mxu0 %v1841_v62 }
 0x203   :  { %v615_v32 = vpack.c.bf16 %v594_v30, %v593_v29  ;;  %v1643_v33 = vpop.f32.mrb[24].mxu1 }
 0x204   :  { %v551_v34 = vadd.f32 %v1643_v33, %v2081_v3  ;;  %v542_v35 = vpop.f32.mrb[25].mxu1 }
 0x205   :  { %v543_v36 = vadd.f32 %v542_v35, %v2081_v3  ;;  %v1644_v37 = vpop.f32.mrb[26].mxu1  ;;  %1685 = vmatprep.mubr.bf16.mxu0 %v615_v32 }
 0x206   :  { %v554_v38 = vadd.f32 %v1644_v37, %v2081_v3  ;;  %v545_v39 = vpop.f32.mrb[27].mxu1  ;;  %1686 = vmatmul.mubr.bf16.gmra.mrb[52].mxu0 %v616_v31  ;;  %v599_v41 = vmax.f32 %v551_v34, 0.0 }
 0x207   :  { %v546_v40 = vadd.f32 %v545_v39, %v2081_v3  ;;  %v597_v43 = vmax.f32 %v543_v36, 0.0 }
 0x208   :  { %v600_v42 = vmax.f32 %v554_v38, 0.0 }
 0x209   :  { %v598_v44 = vmax.f32 %v546_v40, 0.0 }
 0x20a   :  { %v618_v45 = vpack.c.bf16 %v600_v42, %v599_v41 }
 0x20b   :  { %v617_v46 = vpack.c.bf16 %v598_v44, %v597_v43  ;;  %v1647_v47 = vpop.f32.mrb[28].mxu1 }
 0x20c   :  { %v567_v48 = vadd.f32 %v1647_v47, %v2081_v3  ;;  %v558_v49 = vpop.f32.mrb[29].mxu1 }
 0x20d   :  { %v559_v50 = vadd.f32 %v558_v49, %v2081_v3  ;;  %v1648_v51 = vpop.f32.mrb[30].mxu1  ;;  %1689 = vmatprep.mubr.bf16.mxu0 %v617_v46 }
 0x20e   :  { %v570_v52 = vadd.f32 %v1648_v51, %v2081_v3  ;;  %v561_v53 = vpop.f32.mrb[31].mxu1  ;;  %1690 = vmatmul.mubr.bf16.gmra.mrb[56].mxu0 %v618_v45  ;;  %v603_v55 = vmax.f32 %v567_v48, 0.0 }
 0x20f   :  { %v562_v54 = vadd.f32 %v561_v53, %v2081_v3  ;;  %v601_v57 = vmax.f32 %v559_v50, 0.0  ;;  %v1805_v3 = vld [vmem:[%s2310_s1 + $0xc8] sm:$0xff]  }
 0x210   :  { %v604_v56 = vmax.f32 %v570_v52, 0.0  ;;  %1700 = vmatpush3.bf16.msra.mxu1 %v1805_v3 }
 0x211   :  { %v602_v58 = vmax.f32 %v562_v54, 0.0  ;;  %1701 = vmatprep.subr.bf16.mxu1 %v1841_v62 }
 0x212   :  { %v620_v59 = vpack.c.bf16 %v604_v56, %v603_v55 }
 0x213   :  { %v619_v60 = vpack.c.bf16 %v602_v58, %v601_v57 }
 0x214   :  { %1702 = vmatpush3.bf16.msra.mxu1 %v1806_v63 }
 0x215   :  { %1693 = vmatprep.mubr.bf16.mxu0 %v619_v60  ;;  %1703 = vmatprep.subr.bf16.mxu1 %v1841_v62 }
 0x216   :  { %1694 = vmatmul.mubr.bf16.gmra.mrb[60].mxu0 %v620_v59 }
 0x217   :  { %1753 = vmatprep.mubr.msk.bf16.mxu0 %vm1842_vm0, %v1841_v62 }
 0x218   :  { %1704 = vmatpush3.bf16.msra.mxu1 %v1807_v0 }
 0x219   :  { %1705 = vmatprep.subr.bf16.mxu1 %v1841_v62 }
 0x21c   :  { %1706 = vmatpush3.bf16.msra.mxu1 %v1808_v1 }
 0x21d   :  { %1707 = vmatprep.subr.bf16.mxu1 %v1841_v62 }
 0x220   :  { %1708 = vmatpush3.bf16.msra.mxu1 %v1809_v2 }
 0x221   :  { %1709 = vmatprep.subr.bf16.mxu1 %v1841_v62 }
 0x224   :  { %1710 = vmatpush3.bf16.msra.mxu1 %v1810_v11 }
 0x225   :  { %1711 = vmatprep.subr.bf16.mxu1 %v1841_v62 }
 0x228   :  { %1712 = vmatpush3.bf16.msra.mxu1 %v1811_v4 }
 0x229   :  { %1717 = vmatprep.subr.bf16.mxu1 %v1841_v62 }
 0x2b1   :  { %v1667_v15 = vpop.f32.mrb[32].mxu0 }
 0x2b2   :  { %v732_v16 = vadd.f32 %v1667_v15, %v2162_v13  ;;  %v723_v17 = vpop.f32.mrb[33].mxu0 }
 0x2b3   :  { %v724_v18 = vadd.f32 %v723_v17, %v2162_v13  ;;  %v1668_v19 = vpop.f32.mrb[34].mxu0 }
 0x2b4   :  { %v735_v20 = vadd.f32 %v1668_v19, %v2162_v13  ;;  %v726_v21 = vpop.f32.mrb[35].mxu0 }
 0x2b5   :  { %v850_v22 = vmax.f32 %v724_v18, %v732_v16  ;;  %v727_v23 = vadd.f32 %v726_v21, %v2162_v13 }
 0x2b7   :  { %v851_v24 = vmax.f32 %v727_v23, %v735_v20 }
 0x2b9   :  { %v1671_v25 = vpop.f32.mrb[36].mxu0 }
 0x2ba   :  { %v739_v26 = vpop.f32.mrb[37].mxu0  ;;  %v748_v30 = vadd.f32 %v1671_v25, %v2162_v13 }
 0x2bb   :  { %v740_v27 = vadd.f32 %v739_v26, %v2162_v13  ;;  %v1672_v28 = vpop.f32.mrb[38].mxu0 }
 0x2bc   :  { %v742_v29 = vpop.f32.mrb[39].mxu0  ;;  %v751_v33 = vadd.f32 %v1672_v28, %v2162_v13 }
 0x2bd   :  { %v852_v31 = vmax.f32 %v850_v22, %v740_v27  ;;  %v743_v32 = vadd.f32 %v742_v29, %v2162_v13 }
 0x2bf   :  { %v853_v34 = vmax.f32 %v851_v24, %v743_v32  ;;  %v854_v35 = vmax.f32 %v852_v31, %v748_v30 }
 0x2c1   :  { %v1675_v36 = vpop.f32.mrb[40].mxu0  ;;  %v855_v37 = vmax.f32 %v853_v34, %v751_v33 }
 0x2c2   :  { %v755_v38 = vpop.f32.mrb[41].mxu0  ;;  %v764_v42 = vadd.f32 %v1675_v36, %v2162_v13 }
 0x2c3   :  { %v756_v39 = vadd.f32 %v755_v38, %v2162_v13  ;;  %v1676_v40 = vpop.f32.mrb[42].mxu0 }
 0x2c4   :  { %v758_v41 = vpop.f32.mrb[43].mxu0  ;;  %v767_v45 = vadd.f32 %v1676_v40, %v2162_v13 }
 0x2c5   :  { %v856_v43 = vmax.f32 %v854_v35, %v756_v39  ;;  %v759_v44 = vadd.f32 %v758_v41, %v2162_v13 }
 0x2c7   :  { %v857_v46 = vmax.f32 %v855_v37, %v759_v44  ;;  %v858_v47 = vmax.f32 %v856_v43, %v764_v42 }
 0x2c9   :  { %v1679_v48 = vpop.f32.mrb[44].mxu0  ;;  %v859_v49 = vmax.f32 %v857_v46, %v767_v45 }
 0x2ca   :  { %v771_v50 = vpop.f32.mrb[45].mxu0  ;;  %v780_v54 = vadd.f32 %v1679_v48, %v2162_v13 }
 0x2cb   :  { %v772_v51 = vadd.f32 %v771_v50, %v2162_v13  ;;  %v1680_v52 = vpop.f32.mrb[46].mxu0 }
 0x2cc   :  { %v774_v53 = vpop.f32.mrb[47].mxu0  ;;  %v783_v58 = vadd.f32 %v1680_v52, %v2162_v13 }
 0x2cd   :  { %v860_v55 = vmax.f32 %v858_v47, %v772_v51  ;;  %v775_v56 = vadd.f32 %v774_v53, %v2162_v13 }
 0x2cf   :  { %v862_v57 = vmax.f32 %v860_v55, %v780_v54  ;;  %v861_v59 = vmax.f32 %v859_v49, %v775_v56 }
 0x2d1   :  { %v863_v60 = vmax.f32 %v861_v59, %v783_v58  ;;  %v1683_v61 = vpop.f32.mrb[48].mxu0 }
 0x2d2   :  { %v796_v3 = vadd.f32 %v1683_v61, %v2162_v13  ;;  %v787_v63 = vpop.f32.mrb[49].mxu0 }
 0x2d3   :  { %v864_v0 = vmax.f32 %v862_v57, %v863_v60  ;;  %v788_v1 = vadd.f32 %v787_v63, %v2162_v13  ;;  %v1684_v2 = vpop.f32.mrb[50].mxu0 }
 0x2d4   :  { %v799_v11 = vadd.f32 %v1684_v2, %v2162_v13  ;;  %v790_v4 = vpop.f32.mrb[51].mxu0 }
 0x2d5   :  { %v871_v5 = vmax.f32 %v788_v1, %v796_v3  ;;  %v791_v6 = vadd.f32 %v790_v4, %v2162_v13  ;;  %v865_v34 = vrot.slane %v864_v0, 4 }
 0x2d7   :  { %v872_v12 = vmax.f32 %v791_v6, %v799_v11  ;;  %v866_v41 = vmax.f32 %v864_v0, %v865_v34  ;;  %v1814_v6 = vld [vmem:[%s2310_s1 + $0x110] sm:$0xff]  }
 0x2d9   :  { %v1687_v14 = vpop.f32.mrb[52].mxu0  ;;  %v867_v48 = vrot.slane %v866_v41, 2 }
 0x2da   :  { %v803_v15 = vpop.f32.mrb[53].mxu0  ;;  %v812_v19 = vadd.f32 %v1687_v14, %v2162_v13  ;;  %v1816_v14 = vld [vmem:[%s2310_s1 + $0x120] sm:$0xff]  }
 0x2db   :  { %v804_v16 = vadd.f32 %v803_v15, %v2162_v13  ;;  %v1688_v17 = vpop.f32.mrb[54].mxu0  ;;  %v868_v53 = vmax.f32 %v866_v41, %v867_v48  ;;  %v1817_v15 = vld [vmem:[%s2310_s1 + $0x128] sm:$0xff]  }
 0x2dc   :  { %v806_v18 = vpop.f32.mrb[55].mxu0  ;;  %v815_v22 = vadd.f32 %v1688_v17, %v2162_v13  ;;  %v1819_v17 = vld [vmem:[%s2310_s1 + $0x138] sm:$0xff]  }
 0x2dd   :  { %v873_v20 = vmax.f32 %v871_v5, %v804_v16  ;;  %v807_v21 = vadd.f32 %v806_v18, %v2162_v13  ;;  %v869_v56 = vrot.slane %v868_v53, 1  ;;  %v1813_v5 = vld [vmem:[%s2310_s1 + $0x108] sm:$0xff]   ;;  %v1818_v16 = vld [vmem:[%s2310_s1 + $0x130] sm:$0xff]   ;;  %v64_v18 = vld [vmem:[%s2311_s0 + $0x100] sm:$0xff] }
 0x2df   :  { %v874_v23 = vmax.f32 %v872_v12, %v807_v21  ;;  %v875_v24 = vmax.f32 %v873_v20, %v812_v19  ;;  %v870_v59 = vmax.f32 %v868_v53, %v869_v56  ;;  %v1815_v12 = vld [vmem:[%s2310_s1 + $0x118] sm:$0xff]   ;;  %v65_v19 = vld [vmem:[%s2311_s0 + $0x108] sm:$0xff] }
 0x2e0   :  { %v66_v20 = vpack.c.bf16 %v65_v19, %v64_v18  ;;  %v1823_v21 = vld [vmem:[%s2310_s1 + $0x158] sm:$0xff]   ;;  %v1377_v19 = vand.u32 127, %v83_v7 }
 0x2e1   :  { %v1691_v25 = vpop.f32.mrb[56].mxu0  ;;  %v876_v26 = vmax.f32 %v874_v23, %v815_v22  ;;  %v892_v3 = vpack.c.bf16 %v870_v59, %v870_v59  ;;  %1744 = vmatpush3.bf16.msra.mxu0 %v1823_v21  ;;  %v1824_v22 = vld [vmem:[%s2310_s1 + $0x160] sm:$0xff]   ;;  %v1825_v23 = vld [vmem:[%s2310_s1 + $0x168] sm:$0xff]   ;;  %v1834_v59 = vld [vmem:[%s2310_s1 + $0x1b0] sm:$0xff]  }
 0x2e2   :  { %v819_v27 = vpop.f32.mrb[57].mxu0  ;;  %v828_v31 = vadd.f32 %v1691_v25, %v2162_v13  ;;  %1745 = vmatprep.subr.bf16.mxu0 %v1841_v62  ;;  %v1827_v25 = vld [vmem:[%s2310_s1 + $0x178] sm:$0xff]   ;;  %vm1378_vm2 = vcmp.lt.s32.totalorder %v1377_v19, 2 }
 0x2e3   :  { %v820_v28 = vadd.f32 %v819_v27, %v2162_v13  ;;  %v1692_v29 = vpop.f32.mrb[58].mxu0  ;;  %v912_v1 = vunpack.c.l.b16 %v892_v3  ;;  %v1829_v27 = vld [vmem:[%s2310_s1 + $0x188] sm:$0xff]  }
 0x2e4   :  { %v822_v30 = vpop.f32.mrb[59].mxu0  ;;  %v831_v35 = vadd.f32 %v1692_v29, %v2162_v13  ;;  %v1831_v29 = vld [vmem:[%s2310_s1 + $0x198] sm:$0xff]  }
 0x2e5   :  { %v877_v32 = vmax.f32 %v875_v24, %v820_v28  ;;  %v823_v33 = vadd.f32 %v822_v30, %v2162_v13  ;;  %1746 = vmatpush3.bf16.msra.mxu0 %v1824_v22  ;;  %v1826_v24 = vld [vmem:[%s2310_s1 + $0x170] sm:$0xff]   ;;  %v1832_v30 = vld [vmem:[%s2310_s1 + $0x1a0] sm:$0xff]  }
 0x2e6   :  { %1747 = vmatprep.subr.bf16.mxu0 %v1841_v62  ;;  %v1830_v28 = vld [vmem:[%s2310_s1 + $0x190] sm:$0xff]  }
 0x2e7   :  { %v878_v36 = vmax.f32 %v876_v26, %v823_v33  ;;  %v879_v37 = vmax.f32 %v877_v32, %v828_v31  ;;  %v1828_v26 = vld [vmem:[%s2310_s1 + $0x180] sm:$0xff]   ;;  %v1833_v31 = vld [vmem:[%s2310_s1 + $0x1a8] sm:$0xff]  }
 0x2e9   :  { %v1695_v38 = vpop.f32.mrb[60].mxu0  ;;  %v880_v39 = vmax.f32 %v878_v36, %v831_v35  ;;  %1748 = vmatpush3.bf16.msra.mxu0 %v1825_v23  ;;  %v1843_v36 = vmov 1966171168  }
 0x2ea   :  { %v835_v40 = vpop.f32.mrb[61].mxu0  ;;  %v844_v45 = vadd.f32 %v1695_v38, %v2162_v13  ;;  %1749 = vmatprep.subr.bf16.mxu0 %v1841_v62 }
 0x2eb   :  { %v836_v42 = vadd.f32 %v835_v40, %v2162_v13  ;;  %v1696_v43 = vpop.f32.mrb[62].mxu0 }
 0x2ec   :  { %v838_v44 = vpop.f32.mrb[63].mxu0  ;;  %v847_v50 = vadd.f32 %v1696_v43, %v2162_v13  ;;  %v1148_v43 = vsub.s32 3, %v2030_v8 }
 0x2ed   :  { %v881_v46 = vmax.f32 %v879_v37, %v836_v42  ;;  %v839_v47 = vadd.f32 %v838_v44, %v2162_v13  ;;  %v1812_v13 = vld [vmem:[%s2310_s1 + $0x100] sm:$0xff]   ;;  %1750 = vmatpush3.bf16.msra.mxu0 %v1826_v24  ;;  %v1008_v37 = vunpack.c.l.s4 %v1843_v36 }
 0x2ee   :  { %1751 = vmatprep.subr.bf16.mxu0 %v1841_v62 }
 0x2ef   :  { %v883_v49 = vmax.f32 %v881_v46, %v844_v45  ;;  %v882_v51 = vmax.f32 %v880_v39, %v839_v47  ;;  %v1009_v38 = vunpack.c.0.s8 %v1008_v37  ;;  %v1149_v46 = vrot.slane %v2038_v10, %v1148_v43 }
 0x2f0   :  { %v1173_v10 = vsub.s32 4, %v2030_v8 }
 0x2f1   :  { %v884_v52 = vmax.f32 %v882_v51, %v847_v50  ;;  %1752 = vmatpush3.bf16.msra.mxu0 %v1827_v25  ;;  %v1012_v39 = vsub.s32 %v1009_v38, %v2030_v8 }
 0x2f3   :  { %v885_v54 = vmax.f32 %v883_v49, %v884_v52 }
 0x2f5   :  { %v886_v55 = vrot.slane %v885_v54, 4 }
 0x2f7   :  { %v887_v57 = vmax.f32 %v885_v54, %v886_v55 }
 0x2f9   :  { %v888_v58 = vrot.slane %v887_v57, 2 }
 0x2fb   :  { %v889_v60 = vmax.f32 %v887_v57, %v888_v58 }
 0x2fd   :  { %v890_v61 = vrot.slane %v889_v60, 1 }
 0x2ff   :  { %v891_v63 = vmax.f32 %v889_v60, %v890_v61  ;;  %v1840_v60 = vld [vmem:[%s2312_s2] sm:$0xff] }
 0x300   :  { %v1174_v61 = vrot.slane %v1840_v60, %v1173_v10 }
 0x301   :  { %v893_v0 = vpack.c.bf16 %v891_v63, %v891_v63 }
 0x303   :  { %v913_v2 = vunpack.c.l.b16 %v893_v0 }
 0x305   :  { %v915_v11 = vsel %vm914_vm1, %v913_v2, %v912_v1 }
 0x306   :  { %v916_v4 = vpack.c.b16 %v915_v11, %v915_v11 }
 0x308   :  { %1714 = vmatmul.mubr.bf16.vlgmr.msra.gmra.mrb[32].mxu1 %v916_v4 }
 0x309   :  { %1718 = vmatpush3.bf16.msra.mxu1 %v1812_v13  ;;  %1733 = vmatprep.mubr.msk.bf16.mxu1 %vm1842_vm0, %v1841_v62 }
 0x30a   :  { %1719 = vmatprep.subr.bf16.mxu1 %v1841_v62 }
 0x30d   :  { %1720 = vmatpush3.bf16.msra.mxu1 %v1813_v5  ;;  %v1285_v5 = vsub.s32 5, %v2030_v8 }
 0x30e   :  { %1721 = vmatprep.subr.bf16.mxu1 %v1841_v62 }
 0x311   :  { %1722 = vmatpush3.bf16.msra.mxu1 %v1814_v6  ;;  %v1286_v6 = vrot.slane %v1840_v60, %v1285_v5 }
 0x312   :  { %1723 = vmatprep.subr.bf16.mxu1 %v1841_v62 }
 0x315   :  { %1724 = vmatpush3.bf16.msra.mxu1 %v1815_v12 }
 0x316   :  { %1725 = vmatprep.subr.bf16.mxu1 %v1841_v62 }
 0x319   :  { %1726 = vmatpush3.bf16.msra.mxu1 %v1816_v14 }
 0x31a   :  { %1727 = vmatprep.subr.bf16.mxu1 %v1841_v62 }
 0x31d   :  { %1728 = vmatpush3.bf16.msra.mxu1 %v1817_v15 }
 0x31e   :  { %1729 = vmatprep.subr.bf16.mxu1 %v1841_v62 }
 0x321   :  { %1730 = vmatpush3.bf16.msra.mxu1 %v1818_v16 }
 0x322   :  { %1731 = vmatprep.subr.bf16.mxu1 %v1841_v62 }
 0x325   :  { %1732 = vmatpush3.bf16.msra.mxu1 %v1819_v17 }
 0x326   :  { %1757 = vmatprep.subr.bf16.mxu1 %v1841_v62 }
 0x328   :  { %1734 = vmatmul.mubr.bf16.vlgmr.msra.gmra.mrb[36].mxu1 %v66_v20 }
 0x329   :  { %1773 = vmatprep.mubr.msk.bf16.mxu1 %vm1842_vm0, %v1841_v62  ;;  %1758 = vmatpush3.bf16.msra.mxu1 %v1828_v26 }
 0x32a   :  { %1759 = vmatprep.subr.bf16.mxu1 %v1841_v62 }
 0x32d   :  { %1760 = vmatpush3.bf16.msra.mxu1 %v1829_v27 }
 0x32e   :  { %1761 = vmatprep.subr.bf16.mxu1 %v1841_v62 }
 0x331   :  { %1762 = vmatpush3.bf16.msra.mxu1 %v1830_v28 }
 0x332   :  { %1763 = vmatprep.subr.bf16.mxu1 %v1841_v62 }
 0x335   :  { %1764 = vmatpush3.bf16.msra.mxu1 %v1831_v29 }
 0x336   :  { %1765 = vmatprep.subr.bf16.mxu1 %v1841_v62 }
 0x339   :  { %1766 = vmatpush3.bf16.msra.mxu1 %v1832_v30 }
 0x33a   :  { %1767 = vmatprep.subr.bf16.mxu1 %v1841_v62 }
 0x33d   :  { %1768 = vmatpush3.bf16.msra.mxu1 %v1833_v31 }
 0x33e   :  { %1769 = vmatprep.subr.bf16.mxu1 %v1841_v62 }
 0x341   :  { %1770 = vmatpush3.bf16.msra.mxu1 %v1834_v59 }
 0x342   :  { %1771 = vmatprep.subr.bf16.mxu1 %v1841_v62 }
 0x3db   :  { %v1000_v32 = vpop.f32.mrb[32].mxu1 }
 0x3dc   :  { %v1715_v33 = vpop.f32.mrb[33].mxu1  ;;  %v1013_v40 = vrot.slane %v1000_v32, %v1012_v39 }
 0x3dd   :  { %v1003_v34 = vpop.f32.mrb[34].mxu1 }
 0x3de   :  { %v1716_v35 = vpop.f32.mrb[35].mxu1  ;;  %v1014_v41 = vcombine.high %v1013_v40, %v1013_v40  ;;  %v1021_v42 = vrot.slane %v1013_v40, %v1012_v39 }
 0x3e0   :  { %v1028_v44 = vrot.slane %v1014_v41, %v1012_v39  ;;  %v1032_v45 = vrot.slane %v1021_v42, %v2033_v9 }
 0x3e2   :  { %v1036_v50 = vrot.slane %v1028_v44, %v2033_v9  ;;  %v1835_v9 = vld [vmem:[%s2310_s1 + $0x1b8] sm:$0xff]  }
 0x3e3   :  { %1772 = vmatpush3.bf16.msra.mxu1 %v1835_v9 }
 0x3fb   :  { %v1137_v47 = vpop.f32.mrb[36].mxu1 }
 0x3fc   :  { %v1144_v48 = vadd.f32 %v1137_v47, %v1032_v45  ;;  %v1735_v49 = vpop.f32.mrb[37].mxu1 }
 0x3fd   :  { %v1140_v51 = vpop.f32.mrb[38].mxu1 }
 0x3fe   :  { %v1150_v52 = vadd.f32 %v1149_v46, %v1144_v48  ;;  %v1145_v53 = vadd.f32 %v1140_v51, %v1036_v50  ;;  %v1736_v54 = vpop.f32.mrb[39].mxu1 }
 0x400   :  { %v1151_v55 = vadd.f32 %v1149_v46, %v1145_v53  ;;  %v1152_v56 = vmax.f32 %v1150_v52, 0.0 }
 0x402   :  { %v1153_v57 = vmax.f32 %v1151_v55, 0.0 }
 0x404   :  { %v1154_v58 = vpack.c.bf16 %v1153_v57, %v1152_v56 }
 0x406   :  { %1754 = vmatmul.mubr.bf16.vlgmr.msra.gmra.mrb[64].mxu0 %v1154_v58 }
 0x4d9   :  { %v1257_v3 = vpop.f32.mrb[64].mxu0 }
 0x4da   :  { %v1258_v63 = vadd.f32 %v1257_v3, %v1174_v61  ;;  %v1755_v0 = vpop.f32.mrb[65].mxu0 }
 0x4db   :  { %v1260_v1 = vpop.f32.mrb[66].mxu0 }
 0x4dc   :  { %v1261_v2 = vadd.f32 %v1260_v1, %v1174_v61  ;;  %v1756_v11 = vpop.f32.mrb[67].mxu0  ;;  %v1264_v13 = vmax.f32 %v1258_v63, 0.0 }
 0x4de   :  { %v1265_v62 = vmax.f32 %v1261_v2, 0.0 }
 0x4e0   :  { %v1266_v4 = vpack.c.bf16 %v1265_v62, %v1264_v13 }
 0x4e2   :  { %1774 = vmatmul.mubr.bf16.vlgmr.msra.gmra.mrb[40].mxu1 %v1266_v4 }
 0x5b5   :  { %v1369_v12 = vpop.f32.mrb[40].mxu1 }
 0x5b6   :  { %v1370_v14 = vadd.f32 %v1369_v12, %v1286_v6  ;;  %v1775_v15 = vpop.f32.mrb[41].mxu1 }
 0x5b7   :  { %v1372_v16 = vpop.f32.mrb[42].mxu1 }
 0x5b8   :  { %1836 = vtanh.f32 %v1370_v14  ;;  %v1373_v17 = vadd.f32 %v1372_v16, %v1286_v6  ;;  %v1776_v18 = vpop.f32.mrb[43].mxu1 }
 0x5ba   :  { %1838 = vtanh.f32 %v1373_v17 }
 0x5c2   :  { %v1837_v20 = vpop.eup %1836 }
 0x5c3   :  { %v1381_v21 = vsel %vm1378_vm2, %v1837_v20, %v1370_v14 }
 0x5c4   :  { %v1839_v22 = vpop.eup %1838  ;;  %1383 = vst [vmem:[%s2313_s3] sm:$0xff] %v1381_v21 }
 0x5c5   :  { %v1382_v8 = vsel %vm1378_vm2, %v1839_v22, %v1373_v17 }
 0x5c6   :  { %1384 = vst [vmem:[%s2313_s3 + $0x8] sm:$0xff] %v1382_v8 }

</bundles_post_ra>
